<compile_context>
chip_gen: v6e
topology: v6e:2x2x1
jax: 0.10.0
libtpu: 0.0.40
codegen_flags: <defaults>
</compile_context>

<pallas_src>
import functools

import jax
import jax.numpy as jnp
from jax.experimental import pallas as pl
from jax.experimental.pallas import tpu as pltpu


def _round_up(x, m):
    return ((x + m - 1) // m) * m


def _device_kind():
    try:
        return jax.devices()[0].device_kind.lower()
    except Exception:
        return ""


def _default_pack():
    """pack=4 (256-lane matmuls) on v6e/v7x MXUs, pack=2 (128-lane) otherwise."""
    kind = _device_kind()
    return 4 if ("v6" in kind or "v7" in kind) else 2


def _num_tensorcores():
    """TensorCores per chip sharing the 'parallel' grid axis (v7x has 2)."""
    return 2 if "v7" in _device_kind() else 1


# ---------------------------------------------------------------------------
# Kernel
# ---------------------------------------------------------------------------
def _cvp_kernel(x_ref,
                w1_ref, b1_ref, w2_ref, b2_ref,
                w3_ref, b3_ref, w4_ref, b4_ref,
                t_ref, r_ref):
    """One row-tile of the cycled view projection.

    x_ref : (TM, F2)  packed input rows (F2 = pack*dim*dim, multiple of 128)
    wK_ref: (F2, F2)  block-diagonal packed weights (y = x @ W + b); constant
                      index_map + Buffered(1) -> fetched once, VMEM-resident
    bK_ref: (1,  F2)  tiled biases (f32)
    t_ref : (TM, F2)  transform_feature      (packed, lane-dense)
    r_ref : (TM, F2)  retransform_features   (packed, lane-dense)
    """
    cdt = w1_ref.dtype  # MXU operand dtype: f32 = exact, bf16 = fast (f32 accum)
    x = x_ref[...].astype(cdt)

    # transform_module: Linear -> ReLU -> Linear -> ReLU
    h = jnp.dot(x, w1_ref[...], preferred_element_type=jnp.float32) + b1_ref[...]
    h = jnp.maximum(h, 0.0)
    t = jnp.dot(h.astype(cdt), w2_ref[...], preferred_element_type=jnp.float32) + b2_ref[...]
    t = jnp.maximum(t, 0.0)

    # retransform_module: Linear -> ReLU -> Linear -> ReLU (applied to t)
    h = jnp.dot(t.astype(cdt), w3_ref[...], preferred_element_type=jnp.float32) + b3_ref[...]
    h = jnp.maximum(h, 0.0)
    r = jnp.dot(h.astype(cdt), w4_ref[...], preferred_element_type=jnp.float32) + b4_ref[...]
    r = jnp.maximum(r, 0.0)

    t_ref[...] = t.astype(t_ref.dtype)
    r_ref[...] = r.astype(r_ref.dtype)


# ---------------------------------------------------------------------------
# One-time parameter packing (hoisted out of the per-call hot path)
# ---------------------------------------------------------------------------
def prepare_params(params, dim=8, pack=None, dtype=jnp.float32):
    """Transpose torch-style (out,in) weights to (in,out), build block-diagonal
    (pack*F, pack*F) weights and tiled (1, pack*F) biases.  Call once.

    dtype=jnp.bfloat16 stores the weights in bf16 (halves weight DMA bytes and
    cuts MXU passes ~3x on v6e/v7x) at slightly relaxed numerics.
    """
    if pack is None:
        pack = _default_pack()
    F = dim * dim
    w1, b1, w2, b2, w3, b3, w4, b4 = params
    eye = jnp.eye(pack, dtype=jnp.float32)

    def pw(w):  # (out,in) -> block-diag of w.T
        return jnp.kron(eye, w.T.astype(jnp.float32)).astype(dtype)

    def pb(b):  # biases stay f32 (added post-dot in f32)
        return jnp.tile(b.astype(jnp.float32), pack).reshape(1, pack * F)

    return (pw(w1), pb(b1), pw(w2), pb(b2), pw(w3), pb(b3), pw(w4), pb(b4))


# ---------------------------------------------------------------------------
# Wrapper
# ---------------------------------------------------------------------------
@functools.partial(jax.jit, static_argnames=("dim", "tile_m", "pack", "out_dtype"))
def _cvp_call(x, packed_params, *, dim, tile_m, pack, out_dtype):
    B, C, H, W = x.shape
    F = dim * dim
    assert H * W == F, "spatial dims must satisfy H*W == dim*dim"
    F2 = pack * F
    N = B * C
    out_dtype = x.dtype if out_dtype is None else jnp.dtype(out_dtype)

    # --- static row packing / tiling decisions (Python ints at trace time) ---
    N2 = -(-N // pack)                 # packed rows of real data
    N2_pad = _round_up(N2, 8)          # sublane alignment only (usually no pad)
    rows_pad = N2_pad * pack

    n_cores = _num_tensorcores()
    # cap the tile for pack=4 so the f32 intermediates stay well inside v7x's
    # 64 MiB/TC VMEM even if callers raise tile_m
    tile_cap = _round_up(min(tile_m, 1024) if pack >= 4 else tile_m, 8)
    tile = min(tile_cap, N2_pad)
    # >=2 grid steps per TensorCore (>=4 total on 2-TC v7x) so each core can
    # overlap input/output DMA with compute; on 1-TC chips only split when the
    # per-step tile stays >= 512 packed rows (HBM-roofline efficiency).
    target_steps = 2 * n_cores
    min_split_tile = 64 if n_cores > 1 else 512
    split_tile = _round_up(-(-N2_pad // target_steps), 8)
    if split_tile >= min_split_tile:
        tile = min(tile, split_tile)
    grid = (pl.cdiv(N2_pad, tile),)    # last block may be partial (masked writes)

    # --- pack input rows: [N, F] -> [N2_pad, pack*F] --------------------------
    x_flat = x.reshape(N, F)
    if rows_pad != N:
        # Only when B*C isn't a multiple of 8*pack (<= 8*pack-1 padded rows);
        # padded rows pass through bias+ReLU and are sliced off below.
        x_flat = jnp.pad(x_flat, ((0, rows_pad - N), (0, 0)))
    x_packed = x_flat.reshape(N2_pad, F2)

    w1, b1, w2, b2, w3, b3, w4, b4 = packed_params

    row_spec = pl.BlockSpec((tile, F2), lambda i: (i, 0))
    # Weights / biases: constant index_map (fetched once, VMEM-resident) and
    # single-buffered -- no point double-buffering a block that never changes.
    w_spec = pl.BlockSpec((F2, F2), lambda i: (0, 0), pipeline_mode=pl.Buffered(1))
    b_spec = pl.BlockSpec((1, F2), lambda i: (0, 0), pipeline_mode=pl.Buffered(1))

    # --- VMEM budget / scheduler hints ----------------------------------------
    w_bytes = 4 * F2 * F2 * jnp.dtype(w1.dtype).itemsize + 4 * 8 * F2 * 4
    vmem_est = (2 * tile * F2 * x.dtype.itemsize                 # input rows (2-buf)
                + 4 * tile * F2 * jnp.dtype(out_dtype).itemsize  # 2 outputs (2-buf)
                + 6 * tile * F2 * 4                              # f32 intermediates
                + w_bytes)                                       # weights (1-buf) + biases
    vmem_limit = int(min(max(2 * vmem_est, 32 * 1024 * 1024), 64 * 1024 * 1024))

    cost = pl.CostEstimate(
        flops=4 * 2 * N * F * F,
        transcendentals=0,
        bytes_accessed=(N * F * x.dtype.itemsize
                        + 2 * N * F * jnp.dtype(out_dtype).itemsize
                        + w_bytes))

    t_packed, r_packed = pl.pallas_call(
        _cvp_kernel,
        out_shape=(jax.ShapeDtypeStruct((N2_pad, F2), out_dtype),
                   jax.ShapeDtypeStruct((N2_pad, F2), out_dtype)),
        grid_spec=pltpu.PrefetchScalarGridSpec(
            num_scalar_prefetch=0,
            grid=grid,
            in_specs=[row_spec,
                      w_spec, b_spec, w_spec, b_spec,
                      w_spec, b_spec, w_spec, b_spec],
            out_specs=[row_spec, row_spec],
        ),
        compiler_params=pltpu.CompilerParams(
            dimension_semantics=("parallel",),
            vmem_limit_bytes=vmem_limit),
        cost_estimate=cost,
    )(x_packed, w1, b1, w2, b2, w3, b3, w4, b4)

    # --- unpack: [N2_pad, pack*F] -> [N, F] -> [B, C, dim, dim] ----------------
    t = t_packed.reshape(rows_pad, F)[:N].reshape(B, C, dim, dim)
    r = r_packed.reshape(rows_pad, F)[:N].reshape(B, C, dim, dim)
    return t, r


def cycled_view_projection(x, packed_params, *, dim=8, tile_m=1024, pack=None,
                           out_dtype=None):
    """x: [B, C, dim, dim] -> (transform_feature, retransform_features).

    `packed_params` must come from prepare_params(..., pack=pack).  pack=None
    picks the device-appropriate MXU width (4 on v6e/v7x, 2 otherwise).
    out_dtype=jnp.bfloat16 halves output HBM traffic if downstream allows it.
    """
    if pack is None:
        pack = _default_pack()
    F = dim * dim
    if tuple(packed_params[0].shape) != (pack * F, pack * F):
        raise ValueError(
            f"packed_params were built for pack={packed_params[0].shape[0] // F}, "
            f"but wrapper pack={pack}; rebuild with prepare_params(..., pack={pack}).")
    return _cvp_call(x, packed_params, dim=dim, tile_m=tile_m, pack=pack,
                     out_dtype=out_dtype)


# ---------------------------------------------------------------------------
# Synthetic init + pure-JAX reference (matches the PyTorch forward)
# ---------------------------------------------------------------------------
def init_params(key, dim=8):
    """Deterministic synthetic init for the 4 Linear(dim*dim, dim*dim) layers
    (torch-style (out, in) weight layout)."""
    F = dim * dim
    keys = jax.random.split(key, 8)
    scale = 1.0 / jnp.sqrt(F)
    mk_w = lambda k: jax.random.uniform(k, (F, F), jnp.float32, -scale, scale)
    mk_b = lambda k: jax.random.uniform(k, (F,), jnp.float32, -scale, scale)
    return (mk_w(keys[0]), mk_b(keys[1]), mk_w(keys[2]), mk_b(keys[3]),
            mk_w(keys[4]), mk_b(keys[5]), mk_w(keys[6]), mk_b(keys[7]))


def _reference(x, params, dim=8):
    B, C, H, W = x.shape
    F = dim * dim
    w1, b1, w2, b2, w3, b3, w4, b4 = params
    xf = x.reshape(B, C, F)
    h = jnp.maximum(xf @ w1.T + b1, 0.0)
    t = jnp.maximum(h @ w2.T + b2, 0.0)
    h2 = jnp.maximum(t @ w3.T + b3, 0.0)
    r = jnp.maximum(h2 @ w4.T + b4, 0.0)
    return t.reshape(B, C, dim, dim), r.reshape(B, C, dim, dim)


# ---------------------------------------------------------------------------
if __name__ == "__main__":
    dim = 8
    pack = _default_pack()

    key = jax.random.PRNGKey(0)
    kx1, kx2, kx3, kx4, kp = jax.random.split(key, 5)
    params = init_params(kp, dim=dim)
    packed = prepare_params(params, dim=dim, pack=pack)   # one-time packing (f32 = exact)

    def check(x):
        t, r = cycled_view_projection(x, packed, dim=dim, pack=pack)
        jax.block_until_ready((t, r))
        t_ref, r_ref = _reference(x, params, dim=dim)
        assert t.shape == x.shape and r.shape == x.shape
        assert jnp.allclose(t, t_ref, atol=1e-4, rtol=1e-4)
        assert jnp.allclose(r, r_ref, atol=1e-4, rtol=1e-4)

    # 1) small, module-consistent demo shape
    check(jax.random.normal(kx1, (2, 4, dim, dim), dtype=jnp.float32))
    # 2) B*C not a multiple of 8*pack -> exercises the (rare) padding path
    check(jax.random.normal(kx2, (3, 5, dim, dim), dtype=jnp.float32))
    # 3) mid-size batch
    check(jax.random.normal(kx3, (4, 256, dim, dim), dtype=jnp.float32))
    # 4) larger batch -> multi-step "parallel" grid on all chip generations
    check(jax.random.normal(kx4, (8, 512, dim, dim), dtype=jnp.float32))

    print("KERNEL_OK")
</pallas_src>

<mosaic_0001>
module attributes {stable_mosaic.version = 11 : i64} {
  func.func @_cvp_kernel(%arg0: i32, %arg1: memref<8x128xf32, #tpu.memory_space<vmem>>, %arg2: memref<128x128xf32, #tpu.memory_space<vmem>>, %arg3: memref<1x128xf32, #tpu.memory_space<vmem>>, %arg4: memref<128x128xf32, #tpu.memory_space<vmem>>, %arg5: memref<1x128xf32, #tpu.memory_space<vmem>>, %arg6: memref<128x128xf32, #tpu.memory_space<vmem>>, %arg7: memref<1x128xf32, #tpu.memory_space<vmem>>, %arg8: memref<128x128xf32, #tpu.memory_space<vmem>>, %arg9: memref<1x128xf32, #tpu.memory_space<vmem>>, %arg10: memref<8x128xf32, #tpu.memory_space<vmem>>, %arg11: memref<8x128xf32, #tpu.memory_space<vmem>>) attributes {dimension_semantics = [#tpu.dimension_semantics<parallel>], iteration_bounds = array<i64: 1>, scalar_prefetch = 0 : i64, scratch_operands = 0 : i64, tpu.core_type = #tpu.core_type<tc>, window_params = [{transform_indices = @transform_0, window_bounds = array<i64: 8, 128>}, {pipeline_mode = #tpu.pipeline_mode<synchronous>, transform_indices = @transform_1, window_bounds = array<i64: 128, 128>}, {pipeline_mode = #tpu.pipeline_mode<synchronous>, transform_indices = @transform_2, window_bounds = array<i64: 1, 128>}, {pipeline_mode = #tpu.pipeline_mode<synchronous>, transform_indices = @transform_3, window_bounds = array<i64: 128, 128>}, {pipeline_mode = #tpu.pipeline_mode<synchronous>, transform_indices = @transform_4, window_bounds = array<i64: 1, 128>}, {pipeline_mode = #tpu.pipeline_mode<synchronous>, transform_indices = @transform_5, window_bounds = array<i64: 128, 128>}, {pipeline_mode = #tpu.pipeline_mode<synchronous>, transform_indices = @transform_6, window_bounds = array<i64: 1, 128>}, {pipeline_mode = #tpu.pipeline_mode<synchronous>, transform_indices = @transform_7, window_bounds = array<i64: 128, 128>}, {pipeline_mode = #tpu.pipeline_mode<synchronous>, transform_indices = @transform_8, window_bounds = array<i64: 1, 128>}, {transform_indices = @transform_9, window_bounds = array<i64: 8, 128>}, {transform_indices = @transform_10, window_bounds = array<i64: 8, 128>}]} {
    %c0 = arith.constant 0 : index
    %c0_0 = arith.constant 0 : index
    %0 = vector.load %arg1[%c0, %c0_0] : memref<8x128xf32, #tpu.memory_space<vmem>>, vector<8x128xf32>
    %c0_1 = arith.constant 0 : index
    %c0_2 = arith.constant 0 : index
    %1 = vector.load %arg2[%c0_1, %c0_2] : memref<128x128xf32, #tpu.memory_space<vmem>>, vector<128x128xf32>
    %cst = arith.constant dense<0.000000e+00> : vector<8x128xf32>
    %2 = tpu.matmul %0, %1, %cst {dimension_numbers = #tpu.dot_dimension_numbers<[1], [0], [0], [1], [0, 0, 1, 1], [], []>} : vector<8x128xf32>, vector<128x128xf32>, vector<8x128xf32> -> vector<8x128xf32>
    %c0_3 = arith.constant 0 : index
    %c0_4 = arith.constant 0 : index
    %3 = vector.load %arg3[%c0_3, %c0_4] : memref<1x128xf32, #tpu.memory_space<vmem>>, vector<1x128xf32>
    %4 = vector.broadcast %3 : vector<1x128xf32> to vector<8x128xf32>
    %5 = arith.addf %2, %4 : vector<8x128xf32>
    %cst_5 = arith.constant 0.000000e+00 : f32
    %6 = vector.broadcast %cst_5 : f32 to vector<8x128xf32>
    %7 = arith.maximumf %5, %6 : vector<8x128xf32>
    %c0_6 = arith.constant 0 : index
    %c0_7 = arith.constant 0 : index
    %8 = vector.load %arg4[%c0_6, %c0_7] : memref<128x128xf32, #tpu.memory_space<vmem>>, vector<128x128xf32>
    %cst_8 = arith.constant dense<0.000000e+00> : vector<8x128xf32>
    %9 = tpu.matmul %7, %8, %cst_8 {dimension_numbers = #tpu.dot_dimension_numbers<[1], [0], [0], [1], [0, 0, 1, 1], [], []>} : vector<8x128xf32>, vector<128x128xf32>, vector<8x128xf32> -> vector<8x128xf32>
    %c0_9 = arith.constant 0 : index
    %c0_10 = arith.constant 0 : index
    %10 = vector.load %arg5[%c0_9, %c0_10] : memref<1x128xf32, #tpu.memory_space<vmem>>, vector<1x128xf32>
    %11 = vector.broadcast %10 : vector<1x128xf32> to vector<8x128xf32>
    %12 = arith.addf %9, %11 : vector<8x128xf32>
    %cst_11 = arith.constant 0.000000e+00 : f32
    %13 = vector.broadcast %cst_11 : f32 to vector<8x128xf32>
    %14 = arith.maximumf %12, %13 : vector<8x128xf32>
    %c0_12 = arith.constant 0 : index
    %c0_13 = arith.constant 0 : index
    %15 = vector.load %arg6[%c0_12, %c0_13] : memref<128x128xf32, #tpu.memory_space<vmem>>, vector<128x128xf32>
    %cst_14 = arith.constant dense<0.000000e+00> : vector<8x128xf32>
    %16 = tpu.matmul %14, %15, %cst_14 {dimension_numbers = #tpu.dot_dimension_numbers<[1], [0], [0], [1], [0, 0, 1, 1], [], []>} : vector<8x128xf32>, vector<128x128xf32>, vector<8x128xf32> -> vector<8x128xf32>
    %c0_15 = arith.constant 0 : index
    %c0_16 = arith.constant 0 : index
    %17 = vector.load %arg7[%c0_15, %c0_16] : memref<1x128xf32, #tpu.memory_space<vmem>>, vector<1x128xf32>
    %18 = vector.broadcast %17 : vector<1x128xf32> to vector<8x128xf32>
    %19 = arith.addf %16, %18 : vector<8x128xf32>
    %cst_17 = arith.constant 0.000000e+00 : f32
    %20 = vector.broadcast %cst_17 : f32 to vector<8x128xf32>
    %21 = arith.maximumf %19, %20 : vector<8x128xf32>
    %c0_18 = arith.constant 0 : index
    %c0_19 = arith.constant 0 : index
    %22 = vector.load %arg8[%c0_18, %c0_19] : memref<128x128xf32, #tpu.memory_space<vmem>>, vector<128x128xf32>
    %cst_20 = arith.constant dense<0.000000e+00> : vector<8x128xf32>
    %23 = tpu.matmul %21, %22, %cst_20 {dimension_numbers = #tpu.dot_dimension_numbers<[1], [0], [0], [1], [0, 0, 1, 1], [], []>} : vector<8x128xf32>, vector<128x128xf32>, vector<8x128xf32> -> vector<8x128xf32>
    %c0_21 = arith.constant 0 : index
    %c0_22 = arith.constant 0 : index
    %24 = vector.load %arg9[%c0_21, %c0_22] : memref<1x128xf32, #tpu.memory_space<vmem>>, vector<1x128xf32>
    %25 = vector.broadcast %24 : vector<1x128xf32> to vector<8x128xf32>
    %26 = arith.addf %23, %25 : vector<8x128xf32>
    %cst_23 = arith.constant 0.000000e+00 : f32
    %27 = vector.broadcast %cst_23 : f32 to vector<8x128xf32>
    %28 = arith.maximumf %26, %27 : vector<8x128xf32>
    %c0_24 = arith.constant 0 : index
    %c0_25 = arith.constant 0 : index
    %29 = vector.load %arg10[%c0_24, %c0_25] : memref<8x128xf32, #tpu.memory_space<vmem>>, vector<8x128xf32>
    tpu.vector_store %arg10[%c0_24, %c0_25], %14 {strides = array<i32>} : memref<8x128xf32, #tpu.memory_space<vmem>>, vector<8x128xf32>,
    %c0_26 = arith.constant 0 : index
    %c0_27 = arith.constant 0 : index
    %30 = vector.load %arg11[%c0_26, %c0_27] : memref<8x128xf32, #tpu.memory_space<vmem>>, vector<8x128xf32>
    tpu.vector_store %arg11[%c0_26, %c0_27], %28 {strides = array<i32>} : memref<8x128xf32, #tpu.memory_space<vmem>>, vector<8x128xf32>,
    return
  }
  func.func @transform_0(%arg0: i32) -> (i32, i32) {
    %c0_i32 = arith.constant 0 : i32
    %c0_i32_0 = arith.constant 0 : i32
    return %arg0, %c0_i32 : i32, i32
  }
  func.func @transform_1(%arg0: i32) -> (i32, i32) {
    %c0_i32 = arith.constant 0 : i32
    %c0_i32_0 = arith.constant 0 : i32
    %c0_i32_1 = arith.constant 0 : i32
    return %c0_i32, %c0_i32_0 : i32, i32
  }
  func.func @transform_2(%arg0: i32) -> (i32, i32) {
    %c0_i32 = arith.constant 0 : i32
    %c0_i32_0 = arith.constant 0 : i32
    %c0_i32_1 = arith.constant 0 : i32
    return %c0_i32, %c0_i32_0 : i32, i32
  }
  func.func @transform_3(%arg0: i32) -> (i32, i32) {
    %c0_i32 = arith.constant 0 : i32
    %c0_i32_0 = arith.constant 0 : i32
    %c0_i32_1 = arith.constant 0 : i32
    return %c0_i32, %c0_i32_0 : i32, i32
  }
  func.func @transform_4(%arg0: i32) -> (i32, i32) {
    %c0_i32 = arith.constant 0 : i32
    %c0_i32_0 = arith.constant 0 : i32
    %c0_i32_1 = arith.constant 0 : i32
    return %c0_i32, %c0_i32_0 : i32, i32
  }
  func.func @transform_5(%arg0: i32) -> (i32, i32) {
    %c0_i32 = arith.constant 0 : i32
    %c0_i32_0 = arith.constant 0 : i32
    %c0_i32_1 = arith.constant 0 : i32
    return %c0_i32, %c0_i32_0 : i32, i32
  }
  func.func @transform_6(%arg0: i32) -> (i32, i32) {
    %c0_i32 = arith.constant 0 : i32
    %c0_i32_0 = arith.constant 0 : i32
    %c0_i32_1 = arith.constant 0 : i32
    return %c0_i32, %c0_i32_0 : i32, i32
  }
  func.func @transform_7(%arg0: i32) -> (i32, i32) {
    %c0_i32 = arith.constant 0 : i32
    %c0_i32_0 = arith.constant 0 : i32
    %c0_i32_1 = arith.constant 0 : i32
    return %c0_i32, %c0_i32_0 : i32, i32
  }
  func.func @transform_8(%arg0: i32) -> (i32, i32) {
    %c0_i32 = arith.constant 0 : i32
    %c0_i32_0 = arith.constant 0 : i32
    %c0_i32_1 = arith.constant 0 : i32
    return %c0_i32, %c0_i32_0 : i32, i32
  }
  func.func @transform_9(%arg0: i32) -> (i32, i32) {
    %c0_i32 = arith.constant 0 : i32
    %c0_i32_0 = arith.constant 0 : i32
    return %arg0, %c0_i32 : i32, i32
  }
  func.func @transform_10(%arg0: i32) -> (i32, i32) {
    %c0_i32 = arith.constant 0 : i32
    %c0_i32_0 = arith.constant 0 : i32
    return %arg0, %c0_i32 : i32, i32
  }
}

</mosaic_0001>

<bundles_post_ra>
// kernel: _cvp_call.1
= control target key start
LH: loop header
LB: loop body
LE: loop exit
PB: predicated region body
PF: predicated region fallthrough
CT: control target
= control target key end

     0   :  { %16 = vsyncpa [#allocation3], 0  ;;  %s959_s0 = inlined_call_operand.vmem [shape: f32[8,128], index: 0, kind: input, shape index: {}]   ;;  %s960_s1 = inlined_call_operand.hbm [shape: f32[128,128], index: 1, kind: input, shape index: {}]   ;;  %s961_s2 = inlined_call_operand.vmem [shape: f32[1,128], index: 2, kind: input, shape index: {}]   ;;  %s962_s3 = inlined_call_operand.hbm [shape: f32[128,128], index: 3, kind: input, shape index: {}]   ;;  %s963_s4 = inlined_call_operand.vmem [shape: f32[1,128], index: 4, kind: input, shape index: {}]   ;;  %s964_s5 = inlined_call_operand.vmem [shape: f32[128,128], index: 5, kind: input, shape index: {}]   ;;  %s965_s6 = inlined_call_operand.vmem [shape: f32[1,128], index: 6, kind: input, shape index: {}]   ;;  %s966_s7 = inlined_call_operand.hbm [shape: f32[128,128], index: 7, kind: input, shape index: {}]   ;;  %s967_s8 = inlined_call_operand.vmem [shape: f32[1,128], index: 8, kind: input, shape index: {}]   ;;  %s968_s9 = inlined_call_operand.vmem [shape: f32[8,128], index: 9, kind: output, shape index: {0}]   ;;  %s969_s10 = inlined_call_operand.vmem [shape: f32[8,128], index: 10, kind: output, shape index: {1}]  }
   0x1   :  { %17 = vsyncpa [#allocation5], 0  ;;  %s747_s13 = smov [#allocation4]   ;;  %s748_s15 = smov [#allocation2]  }
   0x2   :  { %s39_s14 = sshll.u32 %s747_s13, 4  ;;  %s25_s16 = sshll.u32 %s748_s15, 4  ;;  %s40_s14 = int_to_ptr.vmem [resolvable:$true] %s39_s14  ;;  %s26_s16 = int_to_ptr.vmem [resolvable:$true] %s25_s16 }
   0x3   :  { %s691_s17 = scalar_lea.vmem %s40_s14, 2048  ;;  %p696_p1 = scmp.lt.s32.totalorder %s40_s14, %s40_s14 }
   0x4   :  { %p692_p0 = scmp.ne.s32.totalorder %s40_s14, %s691_s17  ;;  %p697_p2 = scmp.lt.s32.totalorder %s691_s17, %s691_s17 }
   0x6   :  { %p698_p3 = por %p697_p2, %p696_p1 }
   0x8   :  { %p699_p4 = pnand %p698_p3, %p692_p0 }
   0xa   :  { %702 = shalt.err (!%p699_p4)
}
   0xb   :  { %s749_s18 = smov 128   ;;  %s750_s19 = smov 8  }
   0xc   :  { %45 = dma.hbm_to_vmem [thread:$0]  %s962_s3, 2048, %s40_s14, [#allocation5], %s749_s18, %s749_s18, %s750_s19  }
   0xd   :  { %s711_s22 = scalar_lea.vmem %s26_s16, 2048  ;;  %p716_p6 = scmp.lt.s32.totalorder %s26_s16, %s26_s16 }
   0xe   :  { %p712_p5 = scmp.ne.s32.totalorder %s26_s16, %s711_s22  ;;  %p717_p7 = scmp.lt.s32.totalorder %s711_s22, %s711_s22 }
  0x10   :  { %p718_p8 = por %p717_p7, %p716_p6 }
  0x12   :  { %p719_p9 = pnand %p718_p8, %p712_p5 }
  0x14   :  { %722 = shalt.err (!%p719_p9)
}
  0x15   :  { %31 = dma.hbm_to_vmem [thread:$0]  %s960_s1, 2048, %s26_s16, [#allocation3], %s749_s18, %s749_s18, %s750_s19  }
  0x16   :  { %s751_s25 = smov [#allocation6]  }
  0x17   :  { %s57_s26 = sshll.u32 %s751_s25, 4  ;;  %s58_s26 = int_to_ptr.vmem [resolvable:$true] %s57_s26 }
  0x18   :  { %s731_s27 = scalar_lea.vmem %s58_s26, 2048  ;;  %p736_p11 = scmp.lt.s32.totalorder %s58_s26, %s58_s26 }
  0x19   :  { %p732_p10 = scmp.ne.s32.totalorder %s58_s26, %s731_s27  ;;  %p737_p12 = scmp.lt.s32.totalorder %s731_s27, %s731_s27 }
  0x1b   :  { %p738_p13 = por %p737_p12, %p736_p11 }
  0x1d   :  { %p739_p0 = pnand %p738_p13, %p732_p10 }
  0x1f   :  { %742 = shalt.err (!%p739_p0)
}
  0x20   :  { %63 = dma.hbm_to_vmem [thread:$0]  %s966_s7, 2048, %s58_s26, [#allocation5], %s749_s18, %s749_s18, %s750_s19  }
  0x21   :  { %743 = dma.done.wait [#allocation3], 2048  }
  0x22   :  { %744 = vsyncadd [#allocation3], 4294965248 }
  0x23   :  { %745 = dma.done.wait [#allocation5], 4096  }
  0x24   :  { %746 = vsyncadd [#allocation5], 4294963200  ;;  %v752_v0 = vmov 0.0   ;;  %vm753_vm0 = vmmov 0   ;;  %v91_v1 = vld [vmem:[#allocation2 + $0x78] sm:$0xff]  ;;  %v90_v2 = vld [vmem:[#allocation2 + $0x70] sm:$0xff] }
  0x25   :  { %536 = vmatprep.subr.mxu0 %v752_v0  ;;  %568 = vmatprep.mubr.msk.f32.mxu0 %vm753_vm0, %v752_v0  ;;  %v89_v3 = vld [vmem:[#allocation2 + $0x68] sm:$0xff]  ;;  %v88_v4 = vld [vmem:[#allocation2 + $0x60] sm:$0xff]  ;;  %v185_v5 = vld [vmem:[#allocation4 + $0x78] sm:$0xff] }
  0x26   :  { %571 = vmatprep.subr.mxu1 %v752_v0  ;;  %603 = vmatprep.mubr.msk.f32.mxu1 %vm753_vm0, %v752_v0  ;;  %v87_v6 = vld [vmem:[#allocation2 + $0x58] sm:$0xff]  ;;  %v184_v7 = vld [vmem:[#allocation4 + $0x70] sm:$0xff]  ;;  %v183_v8 = vld [vmem:[#allocation4 + $0x68] sm:$0xff] }
  0x27   :  { %537 = vmatpush3.msra.mxu0 %v91_v1  ;;  %572 = vmatpush3.msra.mxu1 %v185_v5  ;;  %v86_v9 = vld [vmem:[#allocation2 + $0x50] sm:$0xff]  ;;  %v182_v10 = vld [vmem:[#allocation4 + $0x60] sm:$0xff]  ;;  %v85_v11 = vld [vmem:[#allocation2 + $0x48] sm:$0xff] }
  0x28   :  { %538 = vmatprep.subr.mxu0 %v752_v0  ;;  %573 = vmatprep.subr.mxu1 %v752_v0  ;;  %v181_v12 = vld [vmem:[#allocation4 + $0x58] sm:$0xff]  ;;  %v84_v13 = vld [vmem:[#allocation2 + $0x40] sm:$0xff]  ;;  %v180_v14 = vld [vmem:[#allocation4 + $0x50] sm:$0xff] }
  0x29   :  { %539 = vmatpush3.msra.mxu0 %v90_v2  ;;  %574 = vmatpush3.msra.mxu1 %v184_v7  ;;  %v83_v15 = vld [vmem:[#allocation2 + $0x38] sm:$0xff]  ;;  %v179_v16 = vld [vmem:[#allocation4 + $0x48] sm:$0xff]  ;;  %v82_v17 = vld [vmem:[#allocation2 + $0x30] sm:$0xff] }
  0x2a   :  { %540 = vmatprep.subr.mxu0 %v752_v0  ;;  %575 = vmatprep.subr.mxu1 %v752_v0  ;;  %v178_v18 = vld [vmem:[#allocation4 + $0x40] sm:$0xff]  ;;  %v81_v19 = vld [vmem:[#allocation2 + $0x28] sm:$0xff]  ;;  %v177_v20 = vld [vmem:[#allocation4 + $0x38] sm:$0xff] }
  0x2b   :  { %541 = vmatpush3.msra.mxu0 %v89_v3  ;;  %576 = vmatpush3.msra.mxu1 %v183_v8  ;;  %v80_v21 = vld [vmem:[#allocation2 + $0x20] sm:$0xff]  ;;  %v176_v22 = vld [vmem:[#allocation4 + $0x30] sm:$0xff]  ;;  %v79_v23 = vld [vmem:[#allocation2 + $0x18] sm:$0xff] }
  0x2c   :  { %542 = vmatprep.subr.mxu0 %v752_v0  ;;  %577 = vmatprep.subr.mxu1 %v752_v0  ;;  %v175_v24 = vld [vmem:[#allocation4 + $0x28] sm:$0xff]  ;;  %v78_v25 = vld [vmem:[#allocation2 + $0x10] sm:$0xff]  ;;  %v174_v26 = vld [vmem:[#allocation4 + $0x20] sm:$0xff] }
  0x2d   :  { %543 = vmatpush3.msra.mxu0 %v88_v4  ;;  %578 = vmatpush3.msra.mxu1 %v182_v10  ;;  %v77_v27 = vld [vmem:[#allocation2 + $0x8] sm:$0xff]  ;;  %v173_v28 = vld [vmem:[#allocation4 + $0x18] sm:$0xff]  ;;  %v76_v29 = vld [vmem:[#allocation2] sm:$0xff] }
  0x2e   :  { %544 = vmatprep.subr.mxu0 %v752_v0  ;;  %579 = vmatprep.subr.mxu1 %v752_v0  ;;  %v75_v30 = vld [vmem:[%s959_s0] sm:$0xff]  ;;  %v172_v31 = vld [vmem:[#allocation4 + $0x10] sm:$0xff]  ;;  %v171_v32 = vld [vmem:[#allocation4 + $0x8] sm:$0xff] }
  0x2f   :  { %545 = vmatpush3.msra.mxu0 %v87_v6  ;;  %580 = vmatpush3.msra.mxu1 %v181_v12  ;;  %v170_v33 = vld [vmem:[#allocation4] sm:$0xff]  ;;  %v279_v34 = vld [vmem:[%s964_s5 + $0x78] sm:$0xff]  ;;  %v278_v35 = vld [vmem:[%s964_s5 + $0x70] sm:$0xff] }
  0x30   :  { %546 = vmatprep.subr.mxu0 %v752_v0  ;;  %581 = vmatprep.subr.mxu1 %v752_v0  ;;  %v277_v36 = vld [vmem:[%s964_s5 + $0x68] sm:$0xff]  ;;  %v276_v37 = vld [vmem:[%s964_s5 + $0x60] sm:$0xff]  ;;  %v275_v38 = vld [vmem:[%s964_s5 + $0x58] sm:$0xff] }
  0x31   :  { %547 = vmatpush3.msra.mxu0 %v86_v9  ;;  %582 = vmatpush3.msra.mxu1 %v180_v14  ;;  %v274_v39 = vld [vmem:[%s964_s5 + $0x50] sm:$0xff]  ;;  %v273_v40 = vld [vmem:[%s964_s5 + $0x48] sm:$0xff]  ;;  %v272_v41 = vld [vmem:[%s964_s5 + $0x40] sm:$0xff] }
  0x32   :  { %548 = vmatprep.subr.mxu0 %v752_v0  ;;  %583 = vmatprep.subr.mxu1 %v752_v0  ;;  %v271_v42 = vld [vmem:[%s964_s5 + $0x38] sm:$0xff]  ;;  %v270_v43 = vld [vmem:[%s964_s5 + $0x30] sm:$0xff]  ;;  %v269_v44 = vld [vmem:[%s964_s5 + $0x28] sm:$0xff] }
  0x33   :  { %549 = vmatpush3.msra.mxu0 %v85_v11  ;;  %584 = vmatpush3.msra.mxu1 %v179_v16  ;;  %v268_v45 = vld [vmem:[%s964_s5 + $0x20] sm:$0xff]  ;;  %v267_v46 = vld [vmem:[%s964_s5 + $0x18] sm:$0xff]  ;;  %v266_v52 = vld [vmem:[%s964_s5 + $0x10] sm:$0xff] }
  0x34   :  { %550 = vmatprep.subr.mxu0 %v752_v0  ;;  %585 = vmatprep.subr.mxu1 %v752_v0  ;;  %v464_v47 = vld [vmem:[%s961_s2] ss:$0 sm:$0xff]  ;;  %v265_v53 = vld [vmem:[%s964_s5 + $0x8] sm:$0xff]  ;;  %v373_v55 = vld [vmem:[#allocation6 + $0x78] sm:$0xff] }
  0x35   :  { %551 = vmatpush3.msra.mxu0 %v84_v13  ;;  %586 = vmatpush3.msra.mxu1 %v178_v18  ;;  %v264_v54 = vld [vmem:[%s964_s5] sm:$0xff]  ;;  %v372_v56 = vld [vmem:[#allocation6 + $0x70] sm:$0xff]  ;;  %v371_v57 = vld [vmem:[#allocation6 + $0x68] sm:$0xff] }
  0x36   :  { %552 = vmatprep.subr.mxu0 %v752_v0  ;;  %587 = vmatprep.subr.mxu1 %v752_v0  ;;  %v370_v58 = vld [vmem:[#allocation6 + $0x60] sm:$0xff]  ;;  %v369_v59 = vld [vmem:[#allocation6 + $0x58] sm:$0xff]  ;;  %v368_v60 = vld [vmem:[#allocation6 + $0x50] sm:$0xff] }
  0x37   :  { %553 = vmatpush3.msra.mxu0 %v83_v15  ;;  %588 = vmatpush3.msra.mxu1 %v177_v20  ;;  %v367_v61 = vld [vmem:[#allocation6 + $0x48] sm:$0xff]  ;;  %v366_v62 = vld [vmem:[#allocation6 + $0x40] sm:$0xff]  ;;  %v365_v63 = vld [vmem:[#allocation6 + $0x38] sm:$0xff] }
  0x38   :  { %554 = vmatprep.subr.mxu0 %v752_v0  ;;  %589 = vmatprep.subr.mxu1 %v752_v0  ;;  %v364_v1 = vld [vmem:[#allocation6 + $0x30] sm:$0xff]  ;;  %v363_v2 = vld [vmem:[#allocation6 + $0x28] sm:$0xff]  ;;  %v362_v3 = vld [vmem:[#allocation6 + $0x20] sm:$0xff] }
  0x39   :  { %555 = vmatpush3.msra.mxu0 %v82_v17  ;;  %590 = vmatpush3.msra.mxu1 %v176_v22  ;;  %v361_v4 = vld [vmem:[#allocation6 + $0x18] sm:$0xff]  ;;  %v465_v5 = vld [vmem:[%s963_s4] ss:$0 sm:$0xff]  ;;  %v360_v10 = vld [vmem:[#allocation6 + $0x10] sm:$0xff] }
  0x3a   :  { %556 = vmatprep.subr.mxu0 %v752_v0  ;;  %591 = vmatprep.subr.mxu1 %v752_v0  ;;  %v359_v11 = vld [vmem:[#allocation6 + $0x8] sm:$0xff]  ;;  %v358_v12 = vld [vmem:[#allocation6] sm:$0xff] }
  0x3b   :  { %557 = vmatpush3.msra.mxu0 %v81_v19  ;;  %592 = vmatpush3.msra.mxu1 %v175_v24  ;;  %v466_v13 = vld [vmem:[%s965_s6] ss:$0 sm:$0xff] }
  0x3c   :  { %558 = vmatprep.subr.mxu0 %v752_v0  ;;  %593 = vmatprep.subr.mxu1 %v752_v0  ;;  %v467_v18 = vld [vmem:[%s967_s8] ss:$0 sm:$0xff] }
  0x3d   :  { %559 = vmatpush3.msra.mxu0 %v80_v21  ;;  %594 = vmatpush3.msra.mxu1 %v174_v26 }
  0x3e   :  { %560 = vmatprep.subr.mxu0 %v752_v0  ;;  %595 = vmatprep.subr.mxu1 %v752_v0 }
  0x3f   :  { %561 = vmatpush3.msra.mxu0 %v79_v23  ;;  %596 = vmatpush3.msra.mxu1 %v173_v28 }
  0x40   :  { %562 = vmatprep.subr.mxu0 %v752_v0  ;;  %597 = vmatprep.subr.mxu1 %v752_v0 }
  0x41   :  { %563 = vmatpush3.msra.mxu0 %v78_v25  ;;  %598 = vmatpush3.msra.mxu1 %v172_v31 }
  0x42   :  { %564 = vmatprep.subr.mxu0 %v752_v0  ;;  %599 = vmatprep.subr.mxu1 %v752_v0 }
  0x43   :  { %565 = vmatpush3.msra.mxu0 %v77_v27  ;;  %600 = vmatpush3.msra.mxu1 %v171_v32 }
  0x44   :  { %566 = vmatprep.subr.mxu0 %v752_v0  ;;  %601 = vmatprep.subr.mxu1 %v752_v0 }
  0x45   :  { %567 = vmatpush3.msra.mxu0 %v76_v29  ;;  %602 = vmatpush3.msra.mxu1 %v170_v33 }
  0x46   :  { %569 = vmatmul.mubr.f32.vlgmr.msra.gmra.mxu0 %v75_v30  ;;  %606 = vmatprep.subr.mxu0 %v752_v0 }
  0x47   :  { %638 = vmatprep.mubr.msk.f32.mxu0 %vm753_vm0, %v752_v0  ;;  %641 = vmatprep.subr.mxu1 %v752_v0 }
  0x48   :  { %607 = vmatpush3.msra.mxu0 %v279_v34 }
  0x49   :  { %608 = vmatprep.subr.mxu0 %v752_v0 }
  0x4a   :  { %609 = vmatpush3.msra.mxu0 %v278_v35 }
  0x4b   :  { %610 = vmatprep.subr.mxu0 %v752_v0 }
  0x4c   :  { %611 = vmatpush3.msra.mxu0 %v277_v36 }
  0x4d   :  { %612 = vmatprep.subr.mxu0 %v752_v0 }
  0x4e   :  { %613 = vmatpush3.msra.mxu0 %v276_v37 }
  0x4f   :  { %614 = vmatprep.subr.mxu0 %v752_v0 }
  0x50   :  { %615 = vmatpush3.msra.mxu0 %v275_v38 }
  0x51   :  { %616 = vmatprep.subr.mxu0 %v752_v0 }
  0x52   :  { %617 = vmatpush3.msra.mxu0 %v274_v39 }
  0x53   :  { %618 = vmatprep.subr.mxu0 %v752_v0 }
  0x54   :  { %619 = vmatpush3.msra.mxu0 %v273_v40 }
  0x55   :  { %620 = vmatprep.subr.mxu0 %v752_v0 }
  0x56   :  { %621 = vmatpush3.msra.mxu0 %v272_v41 }
  0x57   :  { %622 = vmatprep.subr.mxu0 %v752_v0 }
  0x58   :  { %623 = vmatpush3.msra.mxu0 %v271_v42 }
  0x59   :  { %624 = vmatprep.subr.mxu0 %v752_v0 }
  0x5a   :  { %625 = vmatpush3.msra.mxu0 %v270_v43 }
  0x5b   :  { %626 = vmatprep.subr.mxu0 %v752_v0 }
  0x5c   :  { %627 = vmatpush3.msra.mxu0 %v269_v44 }
  0x5d   :  { %628 = vmatprep.subr.mxu0 %v752_v0 }
  0x5e   :  { %629 = vmatpush3.msra.mxu0 %v268_v45 }
  0x5f   :  { %630 = vmatprep.subr.mxu0 %v752_v0 }
  0x60   :  { %631 = vmatpush3.msra.mxu0 %v267_v46 }
  0x61   :  { %632 = vmatprep.subr.mxu0 %v752_v0 }
  0x62   :  { %633 = vmatpush3.msra.mxu0 %v266_v52 }
  0x63   :  { %634 = vmatprep.subr.mxu0 %v752_v0 }
  0x64   :  { %635 = vmatpush3.msra.mxu0 %v265_v53 }
  0x65   :  { %636 = vmatprep.subr.mxu0 %v752_v0 }
  0x66   :  { %637 = vmatpush3.msra.mxu0 %v264_v54 }
 0x106   :  { %v165_v48 = vpop.f32.mrf.mxu0 }
 0x107   :  { %v166_v49 = vadd.f32 %v464_v47, %v165_v48 }
 0x108   :  { %v570_v50 = vpop.f32.mrf.mxu0 }
 0x109   :  { %v169_v51 = vmax.f32 %v166_v49, 0.0 }
 0x10b   :  { %604 = vmatmul.mubr.f32.vlgmr.msra.gmra.mxu1 %v169_v51 }
 0x10c   :  { %673 = vmatprep.mubr.msk.f32.mxu1 %vm753_vm0, %v752_v0  ;;  %642 = vmatpush3.msra.mxu1 %v373_v55 }
 0x10d   :  { %643 = vmatprep.subr.mxu1 %v752_v0 }
 0x10e   :  { %644 = vmatpush3.msra.mxu1 %v372_v56 }
 0x10f   :  { %645 = vmatprep.subr.mxu1 %v752_v0 }
 0x110   :  { %646 = vmatpush3.msra.mxu1 %v371_v57 }
 0x111   :  { %647 = vmatprep.subr.mxu1 %v752_v0 }
 0x112   :  { %648 = vmatpush3.msra.mxu1 %v370_v58 }
 0x113   :  { %649 = vmatprep.subr.mxu1 %v752_v0 }
 0x114   :  { %650 = vmatpush3.msra.mxu1 %v369_v59 }
 0x115   :  { %651 = vmatprep.subr.mxu1 %v752_v0 }
 0x116   :  { %652 = vmatpush3.msra.mxu1 %v368_v60 }
 0x117   :  { %653 = vmatprep.subr.mxu1 %v752_v0 }
 0x118   :  { %654 = vmatpush3.msra.mxu1 %v367_v61 }
 0x119   :  { %655 = vmatprep.subr.mxu1 %v752_v0 }
 0x11a   :  { %656 = vmatpush3.msra.mxu1 %v366_v62 }
 0x11b   :  { %657 = vmatprep.subr.mxu1 %v752_v0 }
 0x11c   :  { %658 = vmatpush3.msra.mxu1 %v365_v63 }
 0x11d   :  { %659 = vmatprep.subr.mxu1 %v752_v0 }
 0x11e   :  { %660 = vmatpush3.msra.mxu1 %v364_v1 }
 0x11f   :  { %661 = vmatprep.subr.mxu1 %v752_v0 }
 0x120   :  { %662 = vmatpush3.msra.mxu1 %v363_v2 }
 0x121   :  { %663 = vmatprep.subr.mxu1 %v752_v0 }
 0x122   :  { %664 = vmatpush3.msra.mxu1 %v362_v3 }
 0x123   :  { %665 = vmatprep.subr.mxu1 %v752_v0 }
 0x124   :  { %666 = vmatpush3.msra.mxu1 %v361_v4 }
 0x125   :  { %667 = vmatprep.subr.mxu1 %v752_v0 }
 0x126   :  { %668 = vmatpush3.msra.mxu1 %v360_v10 }
 0x127   :  { %669 = vmatprep.subr.mxu1 %v752_v0 }
 0x128   :  { %670 = vmatpush3.msra.mxu1 %v359_v11 }
 0x129   :  { %671 = vmatprep.subr.mxu1 %v752_v0 }
 0x12a   :  { %672 = vmatpush3.msra.mxu1 %v358_v12 }
 0x1cb   :  { %v259_v6 = vpop.f32.mrf.mxu1 }
 0x1cc   :  { %v260_v7 = vadd.f32 %v465_v5, %v259_v6 }
 0x1cd   :  { %v605_v8 = vpop.f32.mrf.mxu1 }
 0x1ce   :  { %v263_v9 = vmax.f32 %v260_v7, 0.0 }
 0x1d0   :  { %452 = vst [vmem:[%s968_s9] sm:$0xff] %v263_v9  ;;  %639 = vmatmul.mubr.f32.vlgmr.msra.gmra.mxu0 %v263_v9 }
 0x290   :  { %v353_v14 = vpop.f32.mrf.mxu0 }
 0x291   :  { %v354_v15 = vadd.f32 %v466_v13, %v353_v14 }
 0x292   :  { %v640_v16 = vpop.f32.mrf.mxu0 }
 0x293   :  { %v357_v17 = vmax.f32 %v354_v15, 0.0 }
 0x295   :  { %674 = vmatmul.mubr.f32.vlgmr.msra.gmra.mxu1 %v357_v17 }
 0x355   :  { %v447_v19 = vpop.f32.mrf.mxu1 }
 0x356   :  { %v448_v20 = vadd.f32 %v467_v18, %v447_v19 }
 0x357   :  { %v675_v21 = vpop.f32.mrf.mxu1 }
 0x358   :  { %v451_v22 = vmax.f32 %v448_v20, 0.0 }
 0x35a   :  { %453 = vst [vmem:[%s969_s10] sm:$0xff] %v451_v22 }
 0x35b   :  { %462 = vsyncpa [#allocation3], 1 }
 0x35c   :  { %463 = vsyncpa [#allocation5], 1 }

</bundles_post_ra>
